<compile_context>
chip_gen: v5e
topology: v5e:2x2
jax: 0.10.0
libtpu: 0.0.40
codegen_flags: <defaults>
</compile_context>

<pallas_src>
import jax
import jax.numpy as jnp
from jax.experimental import pallas as pl
from jax.experimental.pallas import tpu as pltpu


def _round_up(x, m):
    return (x + m - 1) // m * m


def _classifier_kernel(x_ref, w1t_ref, b1_ref, w2t_ref, b2_ref, o_ref):
    # x_ref:   (tb, in_dim)  f32  (streamed per batch tile)
    # w1t_ref: (in_dim, hid) bf16, b1_ref: (1, hid) f32   (VMEM-resident)
    # w2t_ref: (hid, out)    bf16, b2_ref: (1, out) f32   (VMEM-resident)
    # o_ref:   (tb, out)     f32
    x = x_ref[...].astype(w1t_ref.dtype)          # f32 -> bf16 in-vreg (VPU filler)
    h = jnp.dot(x, w1t_ref[...], preferred_element_type=jnp.float32)
    h = jnp.maximum(h + b1_ref[...], 0.0)         # bias + ReLU in f32
    # Dropout: identity at inference time.
    h = h.astype(w2t_ref.dtype)                   # back to bf16 for the 2nd MXU pass
    logits = jnp.dot(h, w2t_ref[...], preferred_element_type=jnp.float32)
    o_ref[...] = (logits + b2_ref[...]).astype(o_ref.dtype)


def prepare_classifier_weights(params, compute_dtype=jnp.bfloat16):
    """One-time (per weight update) prep.  weight_norm(dim=None):
    W_eff = g * V / ||V||_F -- the scalar scale is folded in here, then the
    weight is transposed to (in, out) layout and cast to the MXU compute dtype.
    Must be re-run whenever params change (scales are baked in)."""
    s1 = params["g1"] / jnp.linalg.norm(params["v1"])
    s2 = params["g2"] / jnp.linalg.norm(params["v2"])
    w1 = (s1 * params["v1"])                      # (hid, in)
    w2 = (s2 * params["v2"])                      # (out, hid)
    return {
        "w1t": w1.T.astype(compute_dtype),        # (in, hid)
        "b1": params["b1"].astype(jnp.float32).reshape(1, -1),   # (1, hid)
        "w2t": w2.T.astype(compute_dtype),        # (hid, out)
        "b2": params["b2"].astype(jnp.float32).reshape(1, -1),   # (1, out)
    }


def _choose_batch_tile(B, batch_tile):
    """Batch tile: multiple of 16 rows; >=2 grid tiles when B allows so the
    'parallel' batch axis uses both TensorCores on v7x."""
    if B <= 16:
        return _round_up(B, 8)                    # single full/near-full f32 tile
    tb = _round_up(batch_tile, 16)
    tb = min(tb, _round_up(pl.cdiv(B, 2), 16))    # keep at least 2 tiles
    return max(tb, 16)


def simple_classifier_forward(x, prepared, *, batch_tile=1024):
    """x: (B, in_dim) float32.  prepared: output of prepare_classifier_weights."""
    w1t, b1 = prepared["w1t"], prepared["b1"]
    w2t, b2 = prepared["w2t"], prepared["b2"]
    in_dim, hid_dim = w1t.shape
    out_dim = w2t.shape[1]
    B = x.shape[0]
    assert x.shape[1] == in_dim

    tb = _choose_batch_tile(B, batch_tile)
    n_tiles = pl.cdiv(B, tb)

    w_itemsize = jnp.dtype(w1t.dtype).itemsize
    cost = pl.CostEstimate(
        flops=2 * B * (in_dim * hid_dim + hid_dim * out_dim),
        transcendentals=0,
        bytes_accessed=(B * in_dim * x.dtype.itemsize
                        + (in_dim * hid_dim + hid_dim * out_dim) * w_itemsize
                        + (hid_dim + out_dim) * 4
                        + B * out_dim * 4),
    )

    out = pl.pallas_call(
        _classifier_kernel,
        out_shape=jax.ShapeDtypeStruct((B, out_dim), jnp.float32),
        grid_spec=pltpu.PrefetchScalarGridSpec(
            num_scalar_prefetch=0,
            grid=(n_tiles,),
            in_specs=[
                pl.BlockSpec((tb, in_dim), lambda i: (i, 0)),      # x: streamed per batch tile
                pl.BlockSpec((in_dim, hid_dim), lambda i: (0, 0)), # weights VMEM-resident
                pl.BlockSpec((1, hid_dim), lambda i: (0, 0)),
                pl.BlockSpec((hid_dim, out_dim), lambda i: (0, 0)),
                pl.BlockSpec((1, out_dim), lambda i: (0, 0)),
            ],
            out_specs=pl.BlockSpec((tb, out_dim), lambda i: (i, 0)),
        ),
        compiler_params=pltpu.CompilerParams(
            dimension_semantics=("parallel",),     # batch tiles shard across TCs (v7x)
        ),
        cost_estimate=cost,
    )(x, w1t, b1, w2t, b2)

    return out


def init_params(key, in_dim, hid_dim, out_dim):
    k1, k2, k3, k4 = jax.random.split(key, 4)
    v1 = jax.random.normal(k1, (hid_dim, in_dim), jnp.float32) * 0.1
    v2 = jax.random.normal(k2, (out_dim, hid_dim), jnp.float32) * 0.1
    return {
        "v1": v1,
        "g1": jnp.linalg.norm(v1),                 # weight_norm init: g = ||v||
        "b1": jax.random.normal(k3, (hid_dim,), jnp.float32) * 0.01,
        "v2": v2,
        "g2": jnp.linalg.norm(v2),
        "b2": jax.random.normal(k4, (out_dim,), jnp.float32) * 0.01,
    }


if __name__ == "__main__":
    key = jax.random.PRNGKey(0)
    kx, kp = jax.random.split(key)

    B, in_dim, hid_dim, out_dim = 32, 32, 64, 16
    x = jax.random.normal(kx, (B, in_dim), jnp.float32)
    params = init_params(kp, in_dim, hid_dim, out_dim)

    prepared = prepare_classifier_weights(params, compute_dtype=jnp.bfloat16)
    logits = simple_classifier_forward(x, prepared)
    jax.block_until_ready(logits)

    # Pure-JAX f32 reference (eval-mode forward of the PyTorch module).
    w1 = params["g1"] * params["v1"] / jnp.linalg.norm(params["v1"])
    w2 = params["g2"] * params["v2"] / jnp.linalg.norm(params["v2"])
    ref = jnp.maximum(x @ w1.T + params["b1"], 0.0) @ w2.T + params["b2"]

    assert logits.shape == (B, out_dim)
    # bf16 operands with f32 accumulation -> loosened tolerance vs f32 reference.
    assert jnp.allclose(logits, ref, atol=3e-2, rtol=3e-2), (
        float(jnp.max(jnp.abs(logits - ref))))

    print("KERNEL_OK")
</pallas_src>

<mosaic_0001>
module attributes {stable_mosaic.version = 11 : i64} {
  func.func @_classifier_kernel(%arg0: i32, %arg1: memref<16x32xf32, #tpu.memory_space<vmem>>, %arg2: memref<32x64xbf16, #tpu.memory_space<vmem>>, %arg3: memref<1x64xf32, #tpu.memory_space<vmem>>, %arg4: memref<64x16xbf16, #tpu.memory_space<vmem>>, %arg5: memref<1x16xf32, #tpu.memory_space<vmem>>, %arg6: memref<16x16xf32, #tpu.memory_space<vmem>>) attributes {dimension_semantics = [#tpu.dimension_semantics<parallel>], iteration_bounds = array<i64: 2>, scalar_prefetch = 0 : i64, scratch_operands = 0 : i64, tpu.core_type = #tpu.core_type<tc>, window_params = [{transform_indices = @transform_0, window_bounds = array<i64: 16, 32>}, {pipeline_mode = #tpu.pipeline_mode<synchronous>, transform_indices = @transform_1, window_bounds = array<i64: 32, 64>}, {pipeline_mode = #tpu.pipeline_mode<synchronous>, transform_indices = @transform_2, window_bounds = array<i64: 1, 64>}, {pipeline_mode = #tpu.pipeline_mode<synchronous>, transform_indices = @transform_3, window_bounds = array<i64: 64, 16>}, {pipeline_mode = #tpu.pipeline_mode<synchronous>, transform_indices = @transform_4, window_bounds = array<i64: 1, 16>}, {transform_indices = @transform_5, window_bounds = array<i64: 16, 16>}]} {
    %c0 = arith.constant 0 : index
    %c0_0 = arith.constant 0 : index
    %0 = vector.load %arg1[%c0, %c0_0] : memref<16x32xf32, #tpu.memory_space<vmem>>, vector<16x32xf32>
    %1 = arith.truncf %0 : vector<16x32xf32> to vector<16x32xbf16>
    %c0_1 = arith.constant 0 : index
    %c0_2 = arith.constant 0 : index
    %2 = vector.load %arg2[%c0_1, %c0_2] : memref<32x64xbf16, #tpu.memory_space<vmem>>, vector<32x64xbf16>
    %cst = arith.constant dense<0.000000e+00> : vector<16x64xf32>
    %3 = tpu.matmul %1, %2, %cst {dimension_numbers = #tpu.dot_dimension_numbers<[1], [0], [0], [1], [0, 0, 1, 1], [], []>} : vector<16x32xbf16>, vector<32x64xbf16>, vector<16x64xf32> -> vector<16x64xf32>
    %c0_3 = arith.constant 0 : index
    %c0_4 = arith.constant 0 : index
    %4 = vector.load %arg3[%c0_3, %c0_4] : memref<1x64xf32, #tpu.memory_space<vmem>>, vector<1x64xf32>
    %5 = vector.broadcast %4 : vector<1x64xf32> to vector<16x64xf32>
    %6 = arith.addf %3, %5 : vector<16x64xf32>
    %cst_5 = arith.constant 0.000000e+00 : f32
    %7 = vector.broadcast %cst_5 : f32 to vector<16x64xf32>
    %8 = arith.maximumf %6, %7 : vector<16x64xf32>
    %9 = arith.truncf %8 : vector<16x64xf32> to vector<16x64xbf16>
    %c0_6 = arith.constant 0 : index
    %c0_7 = arith.constant 0 : index
    %10 = vector.load %arg4[%c0_6, %c0_7] : memref<64x16xbf16, #tpu.memory_space<vmem>>, vector<64x16xbf16>
    %cst_8 = arith.constant dense<0.000000e+00> : vector<16x16xf32>
    %11 = tpu.matmul %9, %10, %cst_8 {dimension_numbers = #tpu.dot_dimension_numbers<[1], [0], [0], [1], [0, 0, 1, 1], [], []>} : vector<16x64xbf16>, vector<64x16xbf16>, vector<16x16xf32> -> vector<16x16xf32>
    %c0_9 = arith.constant 0 : index
    %c0_10 = arith.constant 0 : index
    %12 = vector.load %arg5[%c0_9, %c0_10] : memref<1x16xf32, #tpu.memory_space<vmem>>, vector<1x16xf32>
    %13 = vector.broadcast %12 : vector<1x16xf32> to vector<16x16xf32>
    %14 = arith.addf %11, %13 : vector<16x16xf32>
    %c0_11 = arith.constant 0 : index
    %c0_12 = arith.constant 0 : index
    %15 = vector.load %arg6[%c0_11, %c0_12] : memref<16x16xf32, #tpu.memory_space<vmem>>, vector<16x16xf32>
    tpu.vector_store %arg6[%c0_11, %c0_12], %14 {strides = array<i32>} : memref<16x16xf32, #tpu.memory_space<vmem>>, vector<16x16xf32>,
    return
  }
  func.func @transform_0(%arg0: i32) -> (i32, i32) {
    %c0_i32 = arith.constant 0 : i32
    %c0_i32_0 = arith.constant 0 : i32
    return %arg0, %c0_i32 : i32, i32
  }
  func.func @transform_1(%arg0: i32) -> (i32, i32) {
    %c0_i32 = arith.constant 0 : i32
    %c0_i32_0 = arith.constant 0 : i32
    %c0_i32_1 = arith.constant 0 : i32
    return %c0_i32, %c0_i32_0 : i32, i32
  }
  func.func @transform_2(%arg0: i32) -> (i32, i32) {
    %c0_i32 = arith.constant 0 : i32
    %c0_i32_0 = arith.constant 0 : i32
    %c0_i32_1 = arith.constant 0 : i32
    return %c0_i32, %c0_i32_0 : i32, i32
  }
  func.func @transform_3(%arg0: i32) -> (i32, i32) {
    %c0_i32 = arith.constant 0 : i32
    %c0_i32_0 = arith.constant 0 : i32
    %c0_i32_1 = arith.constant 0 : i32
    return %c0_i32, %c0_i32_0 : i32, i32
  }
  func.func @transform_4(%arg0: i32) -> (i32, i32) {
    %c0_i32 = arith.constant 0 : i32
    %c0_i32_0 = arith.constant 0 : i32
    %c0_i32_1 = arith.constant 0 : i32
    return %c0_i32, %c0_i32_0 : i32, i32
  }
  func.func @transform_5(%arg0: i32) -> (i32, i32) {
    %c0_i32 = arith.constant 0 : i32
    %c0_i32_0 = arith.constant 0 : i32
    return %arg0, %c0_i32 : i32, i32
  }
}

</mosaic_0001>

<bundles_post_ra>
// kernel: tpu_custom_call.1
= control target key start
LH: loop header
LB: loop body
LE: loop exit
PB: predicated region body
PF: predicated region fallthrough
CT: control target
= control target key end

     0   :  { %10 = vsyncpa [#allocation3], 0  ;;  %s558_s18 = smov 0   ;;  %s603_s0 = inlined_call_operand.vmem [shape: f32[32,32], index: 0, kind: input, shape index: {}]   ;;  %s604_s1 = inlined_call_operand.hbm [shape: bf16[32,64], index: 1, kind: input, shape index: {}]   ;;  %s605_s2 = inlined_call_operand.vmem [shape: f32[1,64], index: 2, kind: input, shape index: {}]   ;;  %s606_s3 = inlined_call_operand.vmem [shape: bf16[64,16], index: 3, kind: input, shape index: {}]   ;;  %s607_s4 = inlined_call_operand.vmem [shape: f32[1,16], index: 4, kind: input, shape index: {}]   ;;  %s608_s5 = inlined_call_operand.vmem [shape: f32[32,16], index: 5, kind: output, shape index: {}]  }
   0x1 LB: > { %s168_s21 = sshll.u32 %s604_s1, 4  ;;  %s415_s22 = sadd.s32 4294967295, %s523_s18   ;;  %s523_s18 = sphi %s558_s18, %s16_s18   ;;  %s169_s21 = int_to_ptr.hbm [resolvable:$true] %s168_s21 }
   0x2   : > { %p417_p0 = scmp.ge.s32.totalorder %s523_s18, 1  ;;  %p157_p1 = scmp.lt.s32.totalorder %s523_s18, 3 }
   0x3   : > { %p468_p2 = scmp.eq.s32.totalorder %s415_s22, 0  ;;  %s525_s23 = smov [#allocation2]  }
   0x4   : > { %p158_p3 = pnand %p417_p0, %p157_p1  ;;  %s170_s24 = sshll.u32 %s525_s23, 4  ;;  %s171_s24 = int_to_ptr.vmem [resolvable:$true] %s170_s24 }
   0x5   : > { %s526_s25 = smov 64   ;;  %s527_s26 = smov 4  }
   0x6   : > { %p464_p4 = pneg %p158_p3  ;;  %204 = sbr.rel (%p158_p3) target bundleno = 298 (0x12a), region = 40 }
   0x8   : > { %p465_p5 = pnand %p468_p2, %p464_p4 }
   0xa   : > { %467 = dma.hbm_to_vmem [thread:$0]  (!%p465_p5), %s169_s21, 256, %s171_s24, [#allocation3], %s526_s25, %s526_s25, %s527_s26  }
   0xb   : > { %518 = dma.done.wait (%p468_p2), [#allocation3], 256  }
   0xc   : > { %520 = vsyncadd (%p468_p2), [#allocation3], 4294967040  ;;  %s422_s27 = sshll.u32 %s415_s22, 1  ;;  %v455_v0 = vld [vmem:[#allocation2 + $0x8] sm:$0xff]  ;;  %v454_v1 = vld [vmem:[#allocation2] sm:$0xff]  ;;  %vm269_vm0 = vcmask 261120  }
   0xd   : > { %p234_p6 = scmp.lt.s32.totalorder %s422_s27, 3  ;;  %279 = vmatpush.bf16.msra.mxu0 %v455_v0  ;;  %v459_v5 = vld [vmem:[%s606_s3 + $0x18] sm:$0xff]  ;;  %v458_v6 = vld [vmem:[%s606_s3 + $0x10] sm:$0xff]  ;;  %v457_v7 = vld [vmem:[%s606_s3 + $0x8] sm:$0xff]  ;;  %vm326_vm1 = vcmask 523264   ;;  %vm344_vm2 = vcmask 130048  }
   0xe   : > { %334 = vmatpush.bf16.msra.mxu1 %v459_v5  ;;  %v456_v8 = vld [vmem:[%s606_s3] sm:$0xff] }
   0xf   : > { %s610_s27 = smov (!%p234_p6, %s422_s27), 3  ;;  %v481_v10 = vld [vmem:[%s605_s2] ss:$0 sm:$0xff] }
  0x10   : > { %s423_s28 = sshll.u32 %s610_s27, 3  ;;  %v482_v17 = vld [vmem:[%s607_s4] ss:$0 sm:$0xff] }
  0x11   : > { %s237_s6 = scalar_lea.vmem %s603_s0, %s423_s28  ;;  %280 = vmatpush.bf16.msra.mxu0 %v454_v1  ;;  %s243_s22 = scalar_lea.vmem %s608_s5, %s423_s28 }
  0x12   : > { %v246_v2 = vld [vmem:[%s237_s6] sm:$0xff]  ;;  %v247_v3 = vld [vmem:[%s237_s6 + $0x8] sm:$0xff]  ;;  %335 = vmatpush.bf16.msra.mxu1 %v458_v6 }
  0x13   : > { %v248_v4 = vpack.c.bf16 %v247_v3, %v246_v2 }
  0x15   : > { %434 = vmatmul.msk.bf16.vlgmr.msra.gmra.mxu0 %vm269_vm0, %v248_v4 }
  0x16   : > { %336 = vmatpush.bf16.msra.mxu1 %v457_v7 }
  0x1a   : > { %337 = vmatpush.bf16.msra.mxu1 %v456_v8 }
  0x92   : > { %v282_v9 = vpop.f32.mrf.mxu0 }
  0x93   : > { %v283_v11 = vadd.f32 %v481_v10, %v282_v9 }
  0x95   : > { %v287_v14 = vmax.f32 %v283_v11, 0.0 }
  0x9a   : > { %v284_v12 = vpop.f32.mrf.mxu0 }
  0x9b   : > { %v285_v13 = vadd.f32 %v481_v10, %v284_v12 }
  0x9d   : > { %v288_v15 = vmax.f32 %v285_v13, 0.0 }
  0x9f   : > { %v289_v16 = vpack.c.bf16 %v288_v15, %v287_v14 }
  0xa1   : > { %451 = vmatmul.msk.bf16.vlgmr.msra.gmra.mxu1 %vm326_vm1, %v289_v16 }
 0x11e   : > { %v339_v18 = vpop.f32.mrf.mxu1 }
 0x11f   : > { %v340_v19 = vadd.f32 %v482_v17, %v339_v18 }
 0x121   : > { %345 = vst.msk [vmem:[%s243_s22] sm:$0xff] %vm344_vm2, %v340_v19 }
 0x126   : > { %v341_v20 = vpop.f32.mrf.mxu1 }
 0x127   : > { %v342_v21 = vadd.f32 %v482_v17, %v341_v20 }
 0x129   : > { %346 = vst.msk [vmem:[%s243_s22 + $0x8] sm:$0xff] %vm344_vm2, %v342_v21 }
 0x12a PF: > { %s16_s18 = sadd.s32 1, %s523_s18  }
 0x12b   : > { %p13_p7 = scmp.ge.s32.totalorder %s16_s18, 4  }
 0x12d   :  { %15 = sbr.rel (!%p13_p7) target bundleno = 1 (0x1), region = 75 }
 0x132   :  { %369 = vsyncpa [#allocation3], 1 }
 0x133   :  { %371 = vsyncpa [#allocation3 + $0x1], 1 }

</bundles_post_ra>
